<compile_context>
chip_gen: v7x
topology: tpu7x:2x2x1
jax: 0.10.0
libtpu: 0.0.40
codegen_flags: <defaults>
</compile_context>

<pallas_src>
import functools

import jax
import jax.numpy as jnp
from jax.experimental import pallas as pl
from jax.experimental.pallas import tpu as pltpu


def _group_attn_kernel(x_ref, wqkv_ref, wproj_ref, bias_ref, o_ref, *,
                       ws, num_heads, scale):
    # x_ref block: (1, ws, W, C) -- one row of windows of one batch element.
    _, _, W, C = x_ref.shape
    wg = W // ws                      # windows in this row
    S = ws * ws                       # tokens per window
    nh = num_heads
    hd = C // nh
    T = wg * S                        # tokens in this block
    cd = wqkv_ref.dtype               # MXU operand (compute) dtype

    xw = x_ref[0]                     # (ws, W, C)

    # --- window regroup: (ws, W, C) -> (T, C), token order (window, r, c) ---
    xg = jnp.stack([xw[:, j * ws:(j + 1) * ws, :] for j in range(wg)],
                   axis=0).reshape(T, C)

    # --- fused QKV: one (T,C)x(C,3C) MXU matmul, f32 accumulation -----------
    qkv = jnp.dot(xg, wqkv_ref[...],
                  preferred_element_type=jnp.float32).astype(cd)   # (T, 3C)

    def split_heads(col_off):
        # per-head (T, hd) lane slices -> batched (nh*wg, S, hd)
        hs = [qkv[:, col_off + n * hd: col_off + (n + 1) * hd]
              for n in range(nh)]
        return jnp.stack(hs, axis=0).reshape(nh * wg, S, hd)

    q = split_heads(0)
    k = split_heads(C)
    v = split_heads(2 * C)

    # --- attention, batched over (head, window); f32 logits & softmax stats -
    a = jnp.einsum('bqd,bkd->bqk', q, k,
                   preferred_element_type=jnp.float32) * scale      # (B',S,S)
    a = a - jnp.max(a, axis=-1, keepdims=True)
    p = jnp.exp(a)
    l = jnp.sum(p, axis=-1, keepdims=True)
    oh = jnp.einsum('bqk,bkd->bqd', p.astype(cd), v,
                    preferred_element_type=jnp.float32)              # (B',S,hd)
    oh = oh * pl.reciprocal(l, approx=True)   # normalize after PV, on the EUP
    # TODO(synk): attn_drop / proj_drop omitted (identity at p=0.0 / eval).

    # --- merge heads (lane concat) and single (T,C)x(C,C) output projection -
    oh = oh.reshape(nh, T, hd)
    oc = jnp.concatenate([oh[n] for n in range(nh)], axis=-1)        # (T, C)
    y = jnp.dot(oc.astype(cd), wproj_ref[...],
                preferred_element_type=jnp.float32)
    y = y + bias_ref[...].astype(jnp.float32)                        # (T, C)

    # --- un-group back to the (ws, W, C) row-of-windows layout and store ----
    y = y.reshape(wg, ws, ws, C)
    yw = jnp.concatenate([y[j] for j in range(wg)], axis=1)          # (ws,W,C)
    o_ref[0] = yw.astype(o_ref.dtype)


def prepare_group_attention_params(wqkv, wproj, bproj, *, dtype=None):
    """One-time weight repack (PyTorch nn.Linear (out,in) layout -> MXU slabs).

    dtype selects the MXU operand dtype (e.g. jnp.bfloat16 on v6e/v7x);
    accumulation and softmax statistics always stay in f32.
    """
    dtype = wqkv.dtype if dtype is None else dtype
    w_qkv = jnp.asarray(wqkv.T, dtype)           # (C, 3C), cols (qkv, head, hd)
    w_proj = jnp.asarray(wproj.T, dtype)         # (C, C),  rows (head, hd)
    b_proj = jnp.asarray(bproj, jnp.float32).reshape(1, -1)   # (1, C), f32 add
    return w_qkv, w_proj, b_proj


def group_attention(x, H, W, params, *, num_heads, ws, qk_scale=None):
    """GroupAttention forward.  x: (B, N, C) with N == H*W.
    params: output of prepare_group_attention_params()."""
    w_qkv, w_proj, b_proj = params
    B, N, C = x.shape
    assert ws != 1 and N == H * W
    assert C % num_heads == 0 and H % ws == 0 and W % ws == 0
    hd = C // num_heads
    scale = qk_scale if qk_scale is not None else hd ** (-0.5)
    hg = H // ws

    # Free layout view + optional cast to the MXU compute dtype; the window
    # regrouping itself lives in the BlockSpec / kernel (no HBM transposes).
    x4 = x.reshape(B, H, W, C).astype(w_qkv.dtype)

    out4 = pl.pallas_call(
        functools.partial(_group_attn_kernel, ws=ws, num_heads=num_heads,
                          scale=scale),
        out_shape=jax.ShapeDtypeStruct((B, H, W, C), x.dtype),
        grid_spec=pltpu.PrefetchScalarGridSpec(
            num_scalar_prefetch=0,
            grid=(B, hg),                     # 2 parallel axes (v7x megacore)
            in_specs=[
                pl.BlockSpec((1, ws, W, C), lambda b, i: (b, i, 0, 0)),
                pl.BlockSpec((C, 3 * C), lambda b, i: (0, 0)),
                pl.BlockSpec((C, C), lambda b, i: (0, 0)),
                pl.BlockSpec((1, C), lambda b, i: (0, 0)),
            ],
            out_specs=pl.BlockSpec((1, ws, W, C), lambda b, i: (b, i, 0, 0)),
        ),
        compiler_params=pltpu.CompilerParams(
            dimension_semantics=("parallel", "parallel"),
            vmem_limit_bytes=32 * 1024 * 1024,
        ),
    )(x4, w_qkv, w_proj, b_proj)

    return out4.reshape(B, N, C)


def group_attention_reference(x, H, W, wqkv, wproj, bproj, *, num_heads, ws,
                              qk_scale=None):
    """Plain-JAX reference mirroring the PyTorch module (eval mode)."""
    B, N, C = x.shape
    hd = C // num_heads
    scale = qk_scale if qk_scale is not None else hd ** (-0.5)
    hg, wg = H // ws, W // ws
    G, S = hg * wg, ws * ws
    xg = (x.reshape(B, hg, ws, wg, ws, C)
           .transpose(0, 1, 3, 2, 4, 5)
           .reshape(B, G, S, C))
    qkv = (xg @ wqkv.T).reshape(B, G, S, 3, num_heads, hd)
    qkv = qkv.transpose(3, 0, 1, 4, 2, 5)               # (3, B, G, nh, S, hd)
    q, k, v = qkv[0], qkv[1], qkv[2]
    attn = jnp.einsum('bgnqd,bgnkd->bgnqk', q, k) * scale
    attn = jax.nn.softmax(attn, axis=-1)
    o = jnp.einsum('bgnqk,bgnkd->bgnqd', attn, v)       # (B, G, nh, S, hd)
    o = o.transpose(0, 1, 3, 2, 4).reshape(B, hg, wg, ws, ws, C)
    o = o.transpose(0, 1, 3, 2, 4, 5).reshape(B, N, C)
    return o @ wproj.T + bproj


if __name__ == "__main__":
    B, C, num_heads = 2, 32, 4
    H = W = 8
    ws = 4
    N = H * W

    key = jax.random.PRNGKey(0)
    kx, kq, kp, kb = jax.random.split(key, 4)
    x = jax.random.normal(kx, (B, N, C), dtype=jnp.float32)
    # Deterministic synthetic weights (PyTorch nn.Linear layout: (out, in)).
    wqkv = jax.random.normal(kq, (3 * C, C), dtype=jnp.float32) * 0.1
    wproj = jax.random.normal(kp, (C, C), dtype=jnp.float32) * 0.1
    bproj = jax.random.normal(kb, (C,), dtype=jnp.float32) * 0.1

    ref = group_attention_reference(x, H, W, wqkv, wproj, bproj,
                                    num_heads=num_heads, ws=ws)

    fwd = jax.jit(
        functools.partial(group_attention, num_heads=num_heads, ws=ws),
        static_argnums=(1, 2))

    # f32 MXU-operand path: tightened tolerance (vs. the old 2e-2); the only
    # non-f32-exact step is the approximate EUP reciprocal in the softmax.
    params_f32 = prepare_group_attention_params(wqkv, wproj, bproj)
    out = jax.block_until_ready(fwd(x, H, W, params_f32))
    assert out.shape == (B, N, C)
    err = float(jnp.max(jnp.abs(out - ref)))
    assert jnp.allclose(out, ref, atol=5e-3, rtol=5e-3), (
        f"f32 max abs diff {err}")

    # bf16 MXU-operand path (v6e/v7x perf mode): f32 accumulation + f32
    # softmax stats; looser tolerance from bf16 operand rounding only.
    params_bf16 = prepare_group_attention_params(wqkv, wproj, bproj,
                                                 dtype=jnp.bfloat16)
    out_bf16 = jax.block_until_ready(fwd(x, H, W, params_bf16))
    err16 = float(jnp.max(jnp.abs(out_bf16 - ref)))
    assert jnp.allclose(out_bf16, ref, atol=5e-2, rtol=5e-2), (
        f"bf16 max abs diff {err16}")

    print("KERNEL_OK")
</pallas_src>

<mosaic_0001>
module attributes {stable_mosaic.version = 11 : i64} {
  func.func @_group_attn_kernel(%arg0: i32, %arg1: i32, %arg2: memref<1x4x8x32xf32, #tpu.memory_space<vmem>>, %arg3: memref<32x96xf32, #tpu.memory_space<vmem>>, %arg4: memref<32x32xf32, #tpu.memory_space<vmem>>, %arg5: memref<1x32xf32, #tpu.memory_space<vmem>>, %arg6: memref<1x4x8x32xf32, #tpu.memory_space<vmem>>) attributes {dimension_semantics = [#tpu.dimension_semantics<parallel>, #tpu.dimension_semantics<parallel>], iteration_bounds = array<i64: 2, 2>, scalar_prefetch = 0 : i64, scratch_operands = 0 : i64, tpu.core_type = #tpu.core_type<tc>, window_params = [{transform_indices = @transform_0, window_bounds = array<i64: 1, 4, 8, 32>}, {pipeline_mode = #tpu.pipeline_mode<synchronous>, transform_indices = @transform_1, window_bounds = array<i64: 32, 96>}, {pipeline_mode = #tpu.pipeline_mode<synchronous>, transform_indices = @transform_2, window_bounds = array<i64: 32, 32>}, {pipeline_mode = #tpu.pipeline_mode<synchronous>, transform_indices = @transform_3, window_bounds = array<i64: 1, 32>}, {transform_indices = @transform_4, window_bounds = array<i64: 1, 4, 8, 32>}]} {
    %c0 = arith.constant 0 : index
    %c0_0 = arith.constant 0 : index
    %c0_1 = arith.constant 0 : index
    %c0_2 = arith.constant 0 : index
    %0 = vector.load %arg2[%c0, %c0_0, %c0_1, %c0_2] : memref<1x4x8x32xf32, #tpu.memory_space<vmem>>, vector<1x4x8x32xf32>
    %1 = vector.shape_cast %0 : vector<1x4x8x32xf32> to vector<4x8x32xf32>
    %2 = vector.extract_strided_slice %1 {offsets = [0, 0, 0], sizes = [4, 4, 32], strides = [1, 1, 1]} : vector<4x8x32xf32> to vector<4x4x32xf32>
    %3 = vector.extract_strided_slice %1 {offsets = [0, 4, 0], sizes = [4, 4, 32], strides = [1, 1, 1]} : vector<4x8x32xf32> to vector<4x4x32xf32>
    %4 = vector.shape_cast %2 : vector<4x4x32xf32> to vector<1x4x4x32xf32>
    %5 = vector.shape_cast %3 : vector<4x4x32xf32> to vector<1x4x4x32xf32>
    %6 = tpu.concatenate %4, %5 in 0 : vector<1x4x4x32xf32>, vector<1x4x4x32xf32> -> vector<2x4x4x32xf32>
    %7 = vector.shape_cast %6 : vector<2x4x4x32xf32> to vector<32x32xf32>
    %c0_3 = arith.constant 0 : index
    %c0_4 = arith.constant 0 : index
    %8 = vector.load %arg3[%c0_3, %c0_4] : memref<32x96xf32, #tpu.memory_space<vmem>>, vector<32x96xf32>
    %cst = arith.constant dense<0.000000e+00> : vector<32x96xf32>
    %9 = tpu.matmul %7, %8, %cst {dimension_numbers = #tpu.dot_dimension_numbers<[1], [0], [0], [1], [0, 0, 1, 1], [], []>} : vector<32x32xf32>, vector<32x96xf32>, vector<32x96xf32> -> vector<32x96xf32>
    %10 = vector.extract_strided_slice %9 {offsets = [0, 0], sizes = [32, 8], strides = [1, 1]} : vector<32x96xf32> to vector<32x8xf32>
    %11 = vector.extract_strided_slice %9 {offsets = [0, 8], sizes = [32, 8], strides = [1, 1]} : vector<32x96xf32> to vector<32x8xf32>
    %12 = vector.extract_strided_slice %9 {offsets = [0, 16], sizes = [32, 8], strides = [1, 1]} : vector<32x96xf32> to vector<32x8xf32>
    %13 = vector.extract_strided_slice %9 {offsets = [0, 24], sizes = [32, 8], strides = [1, 1]} : vector<32x96xf32> to vector<32x8xf32>
    %14 = vector.shape_cast %10 : vector<32x8xf32> to vector<1x32x8xf32>
    %15 = vector.shape_cast %11 : vector<32x8xf32> to vector<1x32x8xf32>
    %16 = vector.shape_cast %12 : vector<32x8xf32> to vector<1x32x8xf32>
    %17 = vector.shape_cast %13 : vector<32x8xf32> to vector<1x32x8xf32>
    %18 = tpu.concatenate %14, %15, %16, %17 in 0 : vector<1x32x8xf32>, vector<1x32x8xf32>, vector<1x32x8xf32>, vector<1x32x8xf32> -> vector<4x32x8xf32>
    %19 = vector.shape_cast %18 : vector<4x32x8xf32> to vector<8x16x8xf32>
    %20 = vector.extract_strided_slice %9 {offsets = [0, 32], sizes = [32, 8], strides = [1, 1]} : vector<32x96xf32> to vector<32x8xf32>
    %21 = vector.extract_strided_slice %9 {offsets = [0, 40], sizes = [32, 8], strides = [1, 1]} : vector<32x96xf32> to vector<32x8xf32>
    %22 = vector.extract_strided_slice %9 {offsets = [0, 48], sizes = [32, 8], strides = [1, 1]} : vector<32x96xf32> to vector<32x8xf32>
    %23 = vector.extract_strided_slice %9 {offsets = [0, 56], sizes = [32, 8], strides = [1, 1]} : vector<32x96xf32> to vector<32x8xf32>
    %24 = vector.shape_cast %20 : vector<32x8xf32> to vector<1x32x8xf32>
    %25 = vector.shape_cast %21 : vector<32x8xf32> to vector<1x32x8xf32>
    %26 = vector.shape_cast %22 : vector<32x8xf32> to vector<1x32x8xf32>
    %27 = vector.shape_cast %23 : vector<32x8xf32> to vector<1x32x8xf32>
    %28 = tpu.concatenate %24, %25, %26, %27 in 0 : vector<1x32x8xf32>, vector<1x32x8xf32>, vector<1x32x8xf32>, vector<1x32x8xf32> -> vector<4x32x8xf32>
    %29 = vector.shape_cast %28 : vector<4x32x8xf32> to vector<8x16x8xf32>
    %30 = vector.extract_strided_slice %9 {offsets = [0, 64], sizes = [32, 8], strides = [1, 1]} : vector<32x96xf32> to vector<32x8xf32>
    %31 = vector.extract_strided_slice %9 {offsets = [0, 72], sizes = [32, 8], strides = [1, 1]} : vector<32x96xf32> to vector<32x8xf32>
    %32 = vector.extract_strided_slice %9 {offsets = [0, 80], sizes = [32, 8], strides = [1, 1]} : vector<32x96xf32> to vector<32x8xf32>
    %33 = vector.extract_strided_slice %9 {offsets = [0, 88], sizes = [32, 8], strides = [1, 1]} : vector<32x96xf32> to vector<32x8xf32>
    %34 = vector.shape_cast %30 : vector<32x8xf32> to vector<1x32x8xf32>
    %35 = vector.shape_cast %31 : vector<32x8xf32> to vector<1x32x8xf32>
    %36 = vector.shape_cast %32 : vector<32x8xf32> to vector<1x32x8xf32>
    %37 = vector.shape_cast %33 : vector<32x8xf32> to vector<1x32x8xf32>
    %38 = tpu.concatenate %34, %35, %36, %37 in 0 : vector<1x32x8xf32>, vector<1x32x8xf32>, vector<1x32x8xf32>, vector<1x32x8xf32> -> vector<4x32x8xf32>
    %39 = vector.shape_cast %38 : vector<4x32x8xf32> to vector<8x16x8xf32>
    "tpu.trace_start"() <{level = 10 : i32, message = "bqd,bkd->bqk"}> : () -> ()
    %cst_5 = arith.constant dense<0.000000e+00> : vector<8x16x16xf32>
    %40 = tpu.matmul %19, %29, %cst_5 {dimension_numbers = #tpu.dot_dimension_numbers<[2], [2], [1], [1], [0, 0, 0, 1, 1, 1], [0], [0]>} : vector<8x16x8xf32>, vector<8x16x8xf32>, vector<8x16x16xf32> -> vector<8x16x16xf32>
    "tpu.trace_stop"() : () -> ()
    %cst_6 = arith.constant 0.353553385 : f32
    %41 = vector.broadcast %cst_6 : f32 to vector<8x16x16xf32>
    %42 = arith.mulf %40, %41 : vector<8x16x16xf32>
    %cst_7 = arith.constant dense<0xFF800000> : vector<8x16xf32>
    %43 = vector.multi_reduction <maximumf>, %42, %cst_7 [2] : vector<8x16x16xf32> to vector<8x16xf32>
    %44 = vector.shape_cast %43 : vector<8x16xf32> to vector<8x16x1xf32>
    %45 = vector.broadcast %44 : vector<8x16x1xf32> to vector<8x16x16xf32>
    %46 = arith.subf %42, %45 : vector<8x16x16xf32>
    %47 = math.exp %46 : vector<8x16x16xf32>
    %cst_8 = arith.constant dense<0.000000e+00> : vector<8x16xf32>
    %48 = vector.multi_reduction <add>, %47, %cst_8 [2] : vector<8x16x16xf32> to vector<8x16xf32>
    %49 = vector.shape_cast %48 : vector<8x16xf32> to vector<8x16x1xf32>
    "tpu.trace_start"() <{level = 10 : i32, message = "bqk,bkd->bqd"}> : () -> ()
    %cst_9 = arith.constant dense<0.000000e+00> : vector<8x16x8xf32>
    %50 = tpu.matmul %47, %39, %cst_9 {dimension_numbers = #tpu.dot_dimension_numbers<[2], [1], [1], [2], [0, 0, 0, 1, 1, 2], [0], [0]>} : vector<8x16x16xf32>, vector<8x16x8xf32>, vector<8x16x8xf32> -> vector<8x16x8xf32>
    "tpu.trace_stop"() : () -> ()
    %51 = tpu.reciprocal %49 {approx = true} : vector<8x16x1xf32> -> vector<8x16x1xf32>
    %52 = vector.broadcast %51 : vector<8x16x1xf32> to vector<8x16x8xf32>
    %53 = arith.mulf %50, %52 : vector<8x16x8xf32>
    %54 = vector.shape_cast %53 : vector<8x16x8xf32> to vector<4x32x8xf32>
    %55 = vector.extract_strided_slice %54 {offsets = [0, 0, 0], sizes = [1, 32, 8], strides = [1, 1, 1]} : vector<4x32x8xf32> to vector<1x32x8xf32>
    %56 = vector.shape_cast %55 : vector<1x32x8xf32> to vector<32x8xf32>
    %57 = vector.extract_strided_slice %54 {offsets = [1, 0, 0], sizes = [1, 32, 8], strides = [1, 1, 1]} : vector<4x32x8xf32> to vector<1x32x8xf32>
    %58 = vector.shape_cast %57 : vector<1x32x8xf32> to vector<32x8xf32>
    %59 = vector.extract_strided_slice %54 {offsets = [2, 0, 0], sizes = [1, 32, 8], strides = [1, 1, 1]} : vector<4x32x8xf32> to vector<1x32x8xf32>
    %60 = vector.shape_cast %59 : vector<1x32x8xf32> to vector<32x8xf32>
    %61 = vector.extract_strided_slice %54 {offsets = [3, 0, 0], sizes = [1, 32, 8], strides = [1, 1, 1]} : vector<4x32x8xf32> to vector<1x32x8xf32>
    %62 = vector.shape_cast %61 : vector<1x32x8xf32> to vector<32x8xf32>
    %63 = tpu.concatenate %56, %58, %60, %62 in 1 : vector<32x8xf32>, vector<32x8xf32>, vector<32x8xf32>, vector<32x8xf32> -> vector<32x32xf32>
    %c0_10 = arith.constant 0 : index
    %c0_11 = arith.constant 0 : index
    %64 = vector.load %arg4[%c0_10, %c0_11] : memref<32x32xf32, #tpu.memory_space<vmem>>, vector<32x32xf32>
    %cst_12 = arith.constant dense<0.000000e+00> : vector<32x32xf32>
    %65 = tpu.matmul %63, %64, %cst_12 {dimension_numbers = #tpu.dot_dimension_numbers<[1], [0], [0], [1], [0, 0, 1, 1], [], []>} : vector<32x32xf32>, vector<32x32xf32>, vector<32x32xf32> -> vector<32x32xf32>
    %c0_13 = arith.constant 0 : index
    %c0_14 = arith.constant 0 : index
    %66 = vector.load %arg5[%c0_13, %c0_14] : memref<1x32xf32, #tpu.memory_space<vmem>>, vector<1x32xf32>
    %67 = vector.broadcast %66 : vector<1x32xf32> to vector<32x32xf32>
    %68 = arith.addf %65, %67 : vector<32x32xf32>
    %69 = vector.shape_cast %68 : vector<32x32xf32> to vector<2x4x4x32xf32>
    %70 = vector.extract_strided_slice %69 {offsets = [0, 0, 0, 0], sizes = [1, 4, 4, 32], strides = [1, 1, 1, 1]} : vector<2x4x4x32xf32> to vector<1x4x4x32xf32>
    %71 = vector.shape_cast %70 : vector<1x4x4x32xf32> to vector<4x4x32xf32>
    %72 = vector.extract_strided_slice %69 {offsets = [1, 0, 0, 0], sizes = [1, 4, 4, 32], strides = [1, 1, 1, 1]} : vector<2x4x4x32xf32> to vector<1x4x4x32xf32>
    %73 = vector.shape_cast %72 : vector<1x4x4x32xf32> to vector<4x4x32xf32>
    %74 = tpu.concatenate %71, %73 in 1 : vector<4x4x32xf32>, vector<4x4x32xf32> -> vector<4x8x32xf32>
    %c0_15 = arith.constant 0 : index
    %c0_16 = arith.constant 0 : index
    %c0_17 = arith.constant 0 : index
    %c0_18 = arith.constant 0 : index
    %75 = vector.load %arg6[%c0_15, %c0_16, %c0_17, %c0_18] : memref<1x4x8x32xf32, #tpu.memory_space<vmem>>, vector<1x4x8x32xf32>
    %76 = vector.shape_cast %75 : vector<1x4x8x32xf32> to vector<4x8x32xf32>
    %77 = vector.shape_cast %74 : vector<4x8x32xf32> to vector<1x4x8x32xf32>
    tpu.vector_store %arg6[%c0_15, %c0_16, %c0_17, %c0_18], %77 {strides = array<i32>} : memref<1x4x8x32xf32, #tpu.memory_space<vmem>>, vector<1x4x8x32xf32>,
    return
  }
  func.func @transform_0(%arg0: i32, %arg1: i32) -> (i32, i32, i32, i32) {
    %c0_i32 = arith.constant 0 : i32
    %c0_i32_0 = arith.constant 0 : i32
    %c0_i32_1 = arith.constant 0 : i32
    return %arg0, %arg1, %c0_i32, %c0_i32_0 : i32, i32, i32, i32
  }
  func.func @transform_1(%arg0: i32, %arg1: i32) -> (i32, i32) {
    %c0_i32 = arith.constant 0 : i32
    %c0_i32_0 = arith.constant 0 : i32
    %c0_i32_1 = arith.constant 0 : i32
    return %c0_i32, %c0_i32_0 : i32, i32
  }
  func.func @transform_2(%arg0: i32, %arg1: i32) -> (i32, i32) {
    %c0_i32 = arith.constant 0 : i32
    %c0_i32_0 = arith.constant 0 : i32
    %c0_i32_1 = arith.constant 0 : i32
    return %c0_i32, %c0_i32_0 : i32, i32
  }
  func.func @transform_3(%arg0: i32, %arg1: i32) -> (i32, i32) {
    %c0_i32 = arith.constant 0 : i32
    %c0_i32_0 = arith.constant 0 : i32
    %c0_i32_1 = arith.constant 0 : i32
    return %c0_i32, %c0_i32_0 : i32, i32
  }
  func.func @transform_4(%arg0: i32, %arg1: i32) -> (i32, i32, i32, i32) {
    %c0_i32 = arith.constant 0 : i32
    %c0_i32_0 = arith.constant 0 : i32
    %c0_i32_1 = arith.constant 0 : i32
    return %arg0, %arg1, %c0_i32, %c0_i32_0 : i32, i32, i32, i32
  }
}

</mosaic_0001>

<bundles_post_ra>
// kernel: group_attention.1
= control target key start
LH: loop header
LB: loop body
LE: loop exit
PB: predicated region body
PF: predicated region fallthrough
CT: control target
= control target key end

     0   :  { %s2906_s15 = smov 0   ;;  %s2908_s16 = smov 0   ;;  %s3299_s0 = inlined_call_operand.vmem [shape: f32[2,8,8,32], index: 0, kind: input, shape index: {}]   ;;  %s3300_s1 = inlined_call_operand.vmem [shape: f32[32,96], index: 1, kind: input, shape index: {}]   ;;  %s3301_s2 = inlined_call_operand.vmem [shape: f32[32,32], index: 2, kind: input, shape index: {}]   ;;  %s3302_s3 = inlined_call_operand.vmem [shape: f32[1,32], index: 3, kind: input, shape index: {}]   ;;  %s3303_s4 = inlined_call_operand.vmem [shape: f32[2,8,8,32], index: 4, kind: output, shape index: {}]  }
   0x1   :  { %s2910_s17 = smov 0   ;;  %s2912_s18 = smov 0  }
   0x2   :  { %s2914_s19 = smov 0  }
   0x3 LB: > { %s23_s20 = sadd.s32 1, %s2863_s17  ;;  %s26_s21 = sadd.s32 1, %s2867_s18  ;;  %s2871_s19 = sphi %s2914_s19, %s14_s19   ;;  %s2867_s18 = sphi %s2912_s18, %s3309_s18   ;;  %s2863_s17 = sphi %s2910_s17, %s3308_s17   ;;  %s2859_s16 = sphi %s2908_s16, %s3307_s16   ;;  %s2855_s15 = sphi %s2906_s15, %s3306_s15  }
   0x4   : > { %p24_p0 = scmp.ge.s32.totalorder %s23_s20, 2  ;;  %p2255_p1 = scmp.ge.s32.totalorder %s2871_s19, 1 }
   0x5   : > { %p183_p2 = scmp.lt.s32.totalorder %s2871_s19, 5 }
   0x6   : > { %s3311_s20 = smov (%p24_p0, %s23_s20), 0  ;;  %s3313_s21 = smov (!%p24_p0, %s26_s21), %s2867_s18 }
   0x7   : > { %p184_p3 = pnand %p2255_p1, %p183_p2  ;;  %p28_p4 = scmp.ge.s32.totalorder %s3313_s21, 2 }
   0x8   : > { %v249_v0 = vld [vmem:[%s3300_s1] sm:$0xff] (!%p184_p3)  ;;  %v250_v1 = vld [vmem:[%s3300_s1 + $0x8] sm:$0xff] (!%p184_p3)  ;;  %v251_v2 = vld [vmem:[%s3300_s1 + $0x10] sm:$0xff] (!%p184_p3)  ;;  %s2256_s28 = sshll.u32 (!%p184_p3), %s2855_s15, 2  ;;  %p218_p5 = scmp.lt.s32.totalorder (!%p184_p3), %s2859_s16, 1  ;;  %vm257_vm0 = vcmask (!%p184_p3), 261120  }
   0x9   : > { %s3315_s21 = smov (%p28_p4, %s3313_s21), 0  ;;  %187 = sbr.rel (%p184_p3) target bundleno = 1437 (0x59d), region = 36 }
   0xa   : > { %v2543_v3 = vpack.c.bf16 (!%p184_p3), %v250_v1, %v249_v0  ;;  %v252_v4 = vld [vmem:[%s3300_s1 + $0x18] sm:$0xff] (!%p184_p3)  ;;  %p220_p6 = scmp.lt.s32.totalorder (!%p184_p3), %s2256_s28, 7  ;;  %vm383_vm1 = vcmask (!%p184_p3), 64512   ;;  %s2873_s11 = smov (!%p184_p3), 120   ;;  %vm1092_vm3 = vcmask (!%p184_p3), 130048   ;;  %vm2021_vm4 = vcmask (!%p184_p3), 195584  }
   0xb   : > { %v2547_v5 = vpack.c.bf16 (!%p184_p3), %v252_v4, %v251_v2  ;;  %s2874_s12 = smov (!%p184_p3), 112   ;;  %s2875_s13 = smov (!%p184_p3), 104   ;;  %vm3021_vm2 = vmpackc.low (!%p184_p3), %vm383_vm1, %vm383_vm1  ;;  %vm2152_vm5 = vcmask (!%p184_p3), 1043456  }
   0xc   : > { %2544 = vmatprep.subr.bf16.mxu1 (!%p184_p3), %v2543_v3  ;;  %s2876_s14 = smov (!%p184_p3), 96   ;;  %s2877_s15 = smov (!%p184_p3), 64  }
   0xd   : > { %2546 = vmatpush3.bf16.msra.mxu1 (!%p184_p3), %v2543_v3  ;;  %s2878_s25 = smov (!%p184_p3), 8   ;;  %s2879_s30 = smov (!%p184_p3), 16  }
   0xe   : > { %2548 = vmatprep.subr.bf16.mxu1 (!%p184_p3), %v2547_v5 }
  0x10   : > { %s3317_s16 = smov (!%p218_p5, %s2859_s16), 1  ;;  %s3319_s28 = smov (!%p220_p6, %s2256_s28), 7 }
  0x11   : > { %s2257_s5 = sshll.u32 %s3317_s16, 3  ;;  %2550 = vmatpush3.bf16.msra.mxu1 %v2547_v5 }
  0x12   : > { %s2948_s6 = sadd.s32 %s2257_s5, %s3319_s28  ;;  %s2880_s5 = smov 24  }
  0x13   : > { %s2258_s7 = sshll.u32 %s2948_s6, 3 }
  0x14   : > { %s225_s10 = scalar_lea.vmem %s3299_s0, %s2258_s7 }
  0x15   : > { %v237_v6 = vld [vmem:[%s225_s10] sm:$0xff]  ;;  %v238_v7 = vld [vmem:[%s225_s10 + $0x8] sm:$0xff]  ;;  %v239_v8 = vld [vmem:[%s225_s10 + $0x10] sm:$0xff] }
  0x16   : > { %v245_v9 = vrot.slane %v237_v6, 4  ;;  %v246_v10 = vrot.slane %v238_v7, 4  ;;  %v253_v11 = vcombine.low %v237_v6, %v238_v7  ;;  %v240_v12 = vld [vmem:[%s225_s10 + $0x18] sm:$0xff]  ;;  %v247_v13 = vrot.slane %v239_v8, 4 }
  0x17   : > { %v254_v14 = vcombine.low %v239_v8, %v240_v12  ;;  %v248_v15 = vrot.slane %v240_v12, 4 }
  0x18   : > { %v255_v16 = vcombine.low %v245_v9, %v246_v10  ;;  %2411 = vmatprep.mubr.msk.f32.mxu1 %vm257_vm0, %v253_v11 }
  0x19   : > { %2412 = vmatmul.mubr.msk.f32.vlgmr.msra.gmra.mrb[0].mxu1 %vm257_vm0, %v254_v14  ;;  %v256_v17 = vcombine.low %v247_v13, %v248_v15 }
  0x1a   : > { %2414 = vmatprep.mubr.msk.f32.mxu1 %vm257_vm0, %v255_v16 }
  0x1d   : > { %2415 = vmatmul.mubr.msk.f32.gmra.mrb[2].mxu1 %vm257_vm0, %v256_v17 }
  0xec   : > { %v2960_v18 = vpop.f32.mrb[0].mxu1 }
  0xed   : > { %v332_v19 = vpop.f32.mrb[1].mxu1 }
  0xee   : > { %355 = vrot.lane.b32.xlu0 %v332_v19, %s2873_s11  ;;  %2421 = vmatprep.mubr.msk.f32.mxu1 %vm383_vm1, %v332_v19  ;;  %v2687_v20 = vpack.i.bf16 %v2960_v18, %v332_v19 }
  0xf0   : > { %v2964_v21 = vpop.f32.mrb[2].mxu1 }
  0xf1   : > { %361 = vrot.lane.b32.xlu1 %v2964_v21, %s2873_s11  ;;  %v342_v22 = vpop.f32.mrb[3].mxu1 }
  0xf2   : > { %357 = vrot.lane.b32.xlu0 %v2960_v18, %s2873_s11  ;;  %2428 = vmatprep.mubr.msk.f32.mxu0 %vm383_vm1, %v342_v22  ;;  %v2692_v23 = vpack.i.bf16 %v2964_v21, %v342_v22 }
  0xf5   : > { %359 = vrot.lane.b32.xlu1 %v342_v22, %s2873_s11 }
  0xf6   : > { %363 = vrot.lane.b32.xlu0 %v332_v19, %s2874_s12 }
  0xf9   : > { %365 = vrot.lane.b32.xlu1 %v2960_v18, %s2874_s12 }
  0xfa   : > { %367 = vrot.lane.b32.xlu0 %v342_v22, %s2874_s12 }
  0xfd   : > { %369 = vrot.lane.b32.xlu1 %v2964_v21, %s2874_s12  ;;  %s235_s12 = scalar_lea.vmem %s3303_s4, %s2258_s7 }
  0xfe   : > { %371 = vrot.lane.b32.xlu0 %v332_v19, %s2875_s13 }
 0x101   : > { %373 = vrot.lane.b32.xlu1 %v2960_v18, %s2875_s13 }
 0x102   : > { %375 = vrot.lane.b32.xlu0 %v342_v22, %s2875_s13 }
 0x105   : > { %377 = vrot.lane.b32.xlu1 %v2964_v21, %s2875_s13 }
 0x106   : > { %2688 = vrot.lane.b32.xlu0 %v2687_v20, %s2876_s14 }
 0x109   : > { %2693 = vrot.lane.b32.xlu1 %v2692_v23, %s2876_s14 }
 0x160   : > { %v356_v24 = vpop.permute.xlu0 %355 }
 0x163   : > { %v2976_v25 = vpop.permute.xlu1 %361 }
 0x164   : > { %v2978_v26 = vpop.permute.xlu0 %357 }
 0x165   : > { %v2697_v27 = vpack.i.bf16 %v2978_v26, %v356_v24 }
 0x167   : > { %2698 = vrot.lane.b32.xlu0 %v2697_v27, %s2876_s14  ;;  %v360_v28 = vpop.permute.xlu1 %359 }
 0x168   : > { %v2702_v29 = vpack.i.bf16 %v2976_v25, %v360_v28  ;;  %v2983_v30 = vpop.permute.xlu0 %363 }
 0x16a   : > { %2703 = vrot.lane.b32.xlu1 %v2702_v29, %s2876_s14 }
 0x16b   : > { %v2986_v31 = vpop.permute.xlu1 %365 }
 0x16c   : > { %v2707_v32 = vpack.i.bf16 %v2986_v31, %v2983_v30  ;;  %v2990_v33 = vpop.permute.xlu0 %367 }
 0x16e   : > { %2708 = vrot.lane.b32.xlu0 %v2707_v32, %s2876_s14 }
 0x16f   : > { %v2993_v34 = vpop.permute.xlu1 %369 }
 0x170   : > { %v2712_v35 = vpack.i.bf16 %v2993_v34, %v2990_v33  ;;  %v2997_v36 = vpop.permute.xlu0 %371 }
 0x172   : > { %2713 = vrot.lane.b32.xlu1 %v2712_v35, %s2876_s14 }
 0x173   : > { %v3000_v37 = vpop.permute.xlu1 %373 }
 0x174   : > { %v3004_v38 = vpack.i.bf16 %v3000_v37, %v2997_v36  ;;  %v3006_v39 = vpop.permute.xlu0 %375 }
 0x176   : > { %2718 = vrot.lane.b32.xlu0 %v3004_v38, %s2876_s14 }
 0x177   : > { %v3010_v40 = vpop.permute.xlu1 %377 }
 0x178   : > { %v3014_v41 = vpack.i.bf16 %v3010_v40, %v3006_v39  ;;  %v2689_v42 = vpop.permute.xlu0 %2688 }
 0x179   : > { %v2691_v43 = vunpack.i.h.bf16 %v2689_v42  ;;  %v2690_v44 = vunpack.i.l.bf16 %v2689_v42 }
 0x17a   : > { %2733 = vrot.lane.b32.xlu0 %v2692_v23, %s2877_s15  ;;  %2723 = vrot.lane.b32.xlu1 %v3014_v41, %s2876_s14 }
 0x17b   : > { %v2551_v46 = vpack.c.bf16 %v2691_v43, %v2690_v44  ;;  %v2694_v47 = vpop.permute.xlu1 %2693 }
 0x17c   : > { %v2696_v48 = vunpack.i.h.bf16 %v2694_v47  ;;  %v2695_v49 = vunpack.i.l.bf16 %v2694_v47 }
 0x17d   : > { %2553 = vmatprep.subr.msk.bf16.mxu1 %vm3021_vm2, %v2551_v46 }
 0x17e   : > { %2556 = vmatpush3.bf16.xpose.msk.msra.mxu1 %vm3021_vm2, %v2551_v46  ;;  %2743 = vrot.lane.b32.xlu0 %v2707_v32, %s2877_s15  ;;  %v2557_v50 = vpack.c.bf16 %v2696_v48, %v2695_v49 }
 0x17f   : > { %2728 = vrot.lane.b32.xlu1 %v2687_v20, %s2877_s15 }
 0x180   : > { %2559 = vmatprep.subr.msk.bf16.mxu0 %vm3021_vm2, %v2557_v50 }
 0x181   : > { %2562 = vmatpush3.bf16.xpose.msk.msra.mxu0 %vm3021_vm2, %v2557_v50 }
 0x183   : > { %2738 = vrot.lane.b32.xlu1 %v2697_v27, %s2877_s15 }
 0x185   : > { %2422 = vmatmul.mubr.msk.f32.vlgmr.msra.gmra.mrb[4].mxu1 %vm383_vm1, %v2960_v18 }
 0x186   : > { %2435 = vmatprep.mubr.msk.f32.mxu1 %vm383_vm1, %v356_v24 }
 0x187   : > { %2748 = vrot.lane.b32.xlu1 %v2702_v29, %s2877_s15 }
 0x188   : > { %2429 = vmatmul.mubr.msk.f32.vlgmr.msra.gmra.mrb[0].mxu0 %vm383_vm1, %v2964_v21 }
 0x189   : > { %2442 = vmatprep.mubr.msk.f32.mxu0 %vm383_vm1, %v360_v28 }
 0x18b   : > { %2753 = vrot.lane.b32.xlu1 %v2712_v35, %s2877_s15 }
 0x1d9   : > { %v2699_v51 = vpop.permute.xlu0 %2698 }
 0x1da   : > { %v2701_v52 = vunpack.i.h.bf16 %v2699_v51  ;;  %v2700_v53 = vunpack.i.l.bf16 %v2699_v51 }
 0x1dc   : > { %v2563_v54 = vpack.c.bf16 %v2701_v52, %v2700_v53  ;;  %v2704_v55 = vpop.permute.xlu1 %2703 }
 0x1dd   : > { %v2706_v56 = vunpack.i.h.bf16 %v2704_v55  ;;  %v2705_v57 = vunpack.i.l.bf16 %v2704_v55 }
 0x1de   : > { %2565 = vmatprep.subr.msk.bf16.mxu1 %vm3021_vm2, %v2563_v54 }
 0x1df   : > { %v2569_v58 = vpack.c.bf16 %v2706_v56, %v2705_v57  ;;  %2568 = vmatpush3.bf16.xpose.msk.msra.mxu1 %vm3021_vm2, %v2563_v54 }
 0x1e0   : > { %v2709_v59 = vpop.permute.xlu0 %2708 }
 0x1e1   : > { %v2711_v60 = vunpack.i.h.bf16 %v2709_v59  ;;  %v2710_v61 = vunpack.i.l.bf16 %v2709_v59  ;;  %2571 = vmatprep.subr.msk.bf16.mxu0 %vm3021_vm2, %v2569_v58 }
 0x1e2   : > { %2574 = vmatpush3.bf16.xpose.msk.msra.mxu0 %vm3021_vm2, %v2569_v58 }
 0x1e3   : > { %v2575_v62 = vpack.c.bf16 %v2711_v60, %v2710_v61 }
 0x1e4   : > { %v2714_v63 = vpop.permute.xlu1 %2713 }
 0x1e5   : > { %v2716_v0 = vunpack.i.h.bf16 %v2714_v63  ;;  %v2715_v1 = vunpack.i.l.bf16 %v2714_v63  ;;  %2577 = vmatprep.subr.msk.bf16.mxu1 %vm3021_vm2, %v2575_v62 }
 0x1e6   : > { %2436 = vmatmul.mubr.msk.f32.vlgmr.msra.gmra.mrb[6].mxu1 %vm383_vm1, %v2978_v26 }
 0x1e7   : > { %v2581_v2 = vpack.c.bf16 %v2716_v0, %v2715_v1  ;;  %2580 = vmatpush3.bf16.xpose.msk.msra.mxu1 %vm3021_vm2, %v2575_v62  ;;  %2449 = vmatprep.mubr.msk.f32.mxu1 %vm383_vm1, %v2983_v30 }
 0x1e8   : > { %v2719_v3 = vpop.permute.xlu0 %2718 }
 0x1e9   : > { %v2721_v4 = vunpack.i.h.bf16 %v2719_v3  ;;  %v2720_v5 = vunpack.i.l.bf16 %v2719_v3  ;;  %2443 = vmatmul.mubr.msk.f32.vlgmr.msra.gmra.mrb[2].mxu0 %vm383_vm1, %v2976_v25  ;;  %2583 = vmatprep.subr.msk.bf16.mxu0 %vm3021_vm2, %v2581_v2 }
 0x1ea   : > { %2586 = vmatpush3.bf16.xpose.msk.msra.mxu0 %vm3021_vm2, %v2581_v2  ;;  %2456 = vmatprep.mubr.msk.f32.mxu0 %vm383_vm1, %v2990_v33 }
 0x1eb   : > { %v2587_v6 = vpack.c.bf16 %v2721_v4, %v2720_v5 }
 0x1ec   : > { %v2724_v7 = vpop.permute.xlu1 %2723  ;;  %v2734_v8 = vpop.permute.xlu0 %2733 }
 0x1ed   : > { %v2726_v9 = vunpack.i.h.bf16 %v2724_v7  ;;  %v2725_v10 = vunpack.i.l.bf16 %v2724_v7  ;;  %2589 = vmatprep.subr.msk.bf16.mxu1 %vm3021_vm2, %v2587_v6  ;;  %v2736_v12 = vunpack.i.h.bf16 %v2734_v8  ;;  %v2735_v13 = vunpack.i.l.bf16 %v2734_v8 }
 0x1ee   : > { %2450 = vmatmul.mubr.msk.f32.vlgmr.msra.gmra.mrb[8].mxu1 %vm383_vm1, %v2986_v31 }
 0x1ef   : > { %v2593_v11 = vpack.c.bf16 %v2726_v9, %v2725_v10  ;;  %2592 = vmatpush3.bf16.xpose.msk.msra.mxu1 %vm3021_vm2, %v2587_v6  ;;  %2463 = vmatprep.mubr.msk.f32.mxu1 %vm383_vm1, %v2997_v36  ;;  %v3084_v19 = vpack.c.bf16 %v2736_v12, %v2735_v13 }
 0x1f0   : > { %v2744_v17 = vpop.permute.xlu0 %2743 }
 0x1f1   : > { %v2729_v14 = vpop.permute.xlu1 %2728  ;;  %2457 = vmatmul.mubr.msk.f32.vlgmr.msra.gmra.mrb[4].mxu0 %vm383_vm1, %v2993_v34  ;;  %2595 = vmatprep.subr.msk.bf16.mxu0 %vm3021_vm2, %v2593_v11  ;;  %v2746_v21 = vunpack.i.h.bf16 %v2744_v17  ;;  %v2745_v22 = vunpack.i.l.bf16 %v2744_v17 }
 0x1f2   : > { %v2731_v15 = vunpack.i.h.bf16 %v2729_v14  ;;  %v2730_v16 = vunpack.i.l.bf16 %v2729_v14  ;;  %2598 = vmatpush3.bf16.xpose.msk.msra.mxu0 %vm3021_vm2, %v2593_v11  ;;  %2470 = vmatprep.mubr.msk.f32.mxu0 %vm383_vm1, %v3006_v39 }
 0x1f3   : > { %v3091_v26 = vpack.c.bf16 %v2746_v21, %v2745_v22 }
 0x1f4   : > { %v2599_v18 = vpack.c.bf16 %v2731_v15, %v2730_v16 }
 0x1f5   : > { %v2739_v20 = vpop.permute.xlu1 %2738 }
 0x1f6   : > { %v2741_v23 = vunpack.i.h.bf16 %v2739_v20  ;;  %v2740_v24 = vunpack.i.l.bf16 %v2739_v20  ;;  %2600 = vmatprep.subr.bf16.mxu1 %v2599_v18  ;;  %2464 = vmatmul.mubr.msk.f32.vlgmr.msra.gmra.mrb[10].mxu1 %vm383_vm1, %v3000_v37 }
 0x1f7   : > { %2602 = vmatpush3.bf16.msra.mxu1 %v2599_v18 }
 0x1f8   : > { %v2607_v25 = vpack.c.bf16 %v2741_v23, %v2740_v24  ;;  %2604 = vmatprep.subr.bf16.mxu1 %v3084_v19 }
 0x1f9   : > { %2471 = vmatmul.mubr.msk.f32.vlgmr.msra.gmra.mrb[6].mxu0 %vm383_vm1, %v3010_v40  ;;  %v2749_v13 = vpop.permute.xlu1 %2748 }
 0x1fa   : > { %2608 = vmatprep.subr.bf16.mxu0 %v2607_v25 }
 0x1fb   : > { %2610 = vmatpush3.bf16.msra.mxu0 %v2607_v25 }
 0x1fc   : > { %2616 = vmatprep.subr.bf16.mxu0 %v3091_v26 }
 0x1fd   : > { %v2754_v14 = vpop.permute.xlu1 %2753 }
 0x258   : > { %v2423_v27 = vpop.f32.mrb[4].mxu1 }
 0x259   : > { %v3094_v28 = vmul.f32 0.35355338, %v2423_v27  ;;  %v458_v29 = vpop.f32.mrb[5].mxu1 }
 0x25a   : > { %v3096_v30 = vmul.f32 0.35355338, %v458_v29  ;;  %v2750_v29 = vunpack.i.l.bf16 %v2749_v13 }
 0x25b   : > { %v2430_v31 = vpop.f32.mrb[0].mxu0  ;;  %v1096_v32 = vsel %vm1092_vm3, %v3094_v28, -inf }
 0x25c   : > { %v3100_v33 = vmul.f32 0.35355338, %v2430_v31  ;;  %1097 = vmax.xlane.f32.xlu1 %v1096_v32  ;;  %v545_v34 = vpop.f32.mrb[1].mxu0  ;;  %v1093_v35 = vsel %vm1092_vm3, %v3096_v30, -inf  ;;  %v2756_v32 = vunpack.i.h.bf16 %v2754_v14 }
 0x25d   : > { %v3104_v36 = vmul.f32 0.35355338, %v545_v34  ;;  %1094 = vmax.xlane.f32.xlu0 %v1093_v35 }
 0x25e   : > { %v1102_v37 = vsel %vm1092_vm3, %v3100_v33, -inf }
 0x25f   : > { %v1099_v39 = vsel %vm1092_vm3, %v3104_v36, -inf }
 0x260   : > { %1103 = vmax.xlane.f32.xlu1 %v1102_v37 }
 0x261   : > { %1100 = vmax.xlane.f32.xlu0 %v1099_v39 }
 0x2b9   : > { %v2437_v40 = vpop.f32.mrb[6].mxu1 }
 0x2ba   : > { %v3110_v42 = vmul.f32 0.35355338, %v2437_v40  ;;  %v632_v43 = vpop.f32.mrb[7].mxu1 }
 0x2bb   : > { %v3112_v44 = vmul.f32 0.35355338, %v632_v43 }
 0x2bc   : > { %v2444_v45 = vpop.f32.mrb[2].mxu0  ;;  %v1108_v46 = vsel %vm1092_vm3, %v3110_v42, -inf }
 0x2bd   : > { %v3116_v47 = vmul.f32 0.35355338, %v2444_v45  ;;  %1109 = vmax.xlane.f32.xlu0 %v1108_v46  ;;  %v719_v48 = vpop.f32.mrb[3].mxu0  ;;  %v1105_v51 = vsel %vm1092_vm3, %v3112_v44, -inf }
 0x2be   : > { %v3118_v49 = vmul.f32 0.35355338, %v719_v48 }
 0x2bf   : > { %v1114_v50 = vsel %vm1092_vm3, %v3116_v47, -inf }
 0x2c0   : > { %1115 = vmax.xlane.f32.xlu1 %v1114_v50  ;;  %v1111_v55 = vsel %vm1092_vm3, %v3118_v49, -inf }
 0x2c1   : > { %v2451_v52 = vpop.f32.mrb[8].mxu1  ;;  %1106 = vmax.xlane.f32.xlu0 %v1105_v51 }
 0x2c2   : > { %v3124_v53 = vmul.f32 0.35355338, %v2451_v52  ;;  %v806_v54 = vpop.f32.mrb[9].mxu1 }
 0x2c3   : > { %v3128_v56 = vmul.f32 0.35355338, %v806_v54 }
 0x2c4   : > { %1112 = vmax.xlane.f32.xlu1 %v1111_v55  ;;  %v2458_v57 = vpop.f32.mrb[4].mxu0  ;;  %v1120_v58 = vsel %vm1092_vm3, %v3124_v53, -inf }
 0x2c5   : > { %v3132_v59 = vmul.f32 0.35355338, %v2458_v57  ;;  %1121 = vmax.xlane.f32.xlu0 %v1120_v58  ;;  %v893_v60 = vpop.f32.mrb[5].mxu0  ;;  %v1117_v63 = vsel %vm1092_vm3, %v3128_v56, -inf }
 0x2c6   : > { %v3134_v61 = vmul.f32 0.35355338, %v893_v60 }
 0x2c7   : > { %v1126_v62 = vsel %vm1092_vm3, %v3132_v59, -inf }
 0x2c8   : > { %1127 = vmax.xlane.f32.xlu1 %v1126_v62  ;;  %v1123_v3 = vsel %vm1092_vm3, %v3134_v61, -inf }
 0x2c9   : > { %v2465_v0 = vpop.f32.mrb[10].mxu1  ;;  %1118 = vmax.xlane.f32.xlu0 %v1117_v63 }
 0x2ca   : > { %v3140_v1 = vmul.f32 0.35355338, %v2465_v0  ;;  %v980_v2 = vpop.f32.mrb[11].mxu1 }
 0x2cb   : > { %v3144_v4 = vmul.f32 0.35355338, %v980_v2 }
 0x2cc   : > { %1124 = vmax.xlane.f32.xlu1 %v1123_v3  ;;  %v2472_v5 = vpop.f32.mrb[6].mxu0  ;;  %v1132_v6 = vsel %vm1092_vm3, %v3140_v1, -inf }
 0x2cd   : > { %1133 = vmax.xlane.f32.xlu0 %v1132_v6  ;;  %v1067_v7 = vpop.f32.mrb[7].mxu0  ;;  %v3150_v9 = vmul.f32 0.35355338, %v2472_v5  ;;  %v1129_v10 = vsel %vm1092_vm3, %v3144_v4, -inf }
 0x2ce   : > { %v3148_v8 = vmul.f32 0.35355338, %v1067_v7 }
 0x2cf   : > { %v1138_v12 = vsel %vm1092_vm3, %v3150_v9, -inf }
 0x2d0   : > { %v1135_v11 = vsel %vm1092_vm3, %v3148_v8, -inf }
 0x2d1   : > { %1130 = vmax.xlane.f32.xlu0 %v1129_v10  ;;  %1136 = vmax.xlane.f32.xlu1 %v1135_v11 }
 0x2d5   : > { %1139 = vmax.xlane.f32.xlu0 %v1138_v12 }
 0x2e2   : > { %2763 = vrot.lane.b32.xlu1 %v3014_v41, %s2877_s15 }
 0x2e9   : > { %v1098_v15 = vpop.xlane.xlu1 %1097 }
 0x2ea   : > { %v1142_v16 = vsub.f32 %v3094_v28, %v1098_v15  ;;  %v1095_v17 = vpop.xlane.xlu0 %1094  ;;  %v2751_v28 = vunpack.i.h.bf16 %v2749_v13 }
 0x2eb   : > { %v1141_v18 = vsub.f32 %v3096_v30, %v1095_v17  ;;  %2758 = vrot.lane.b32.xlu0 %v3004_v38, %s2877_s15 }
 0x2ec   : > { %v1159_v20 = vmul.f32 1.442695, %v1142_v16  ;;  %v2611_v38 = vpack.c.bf16 %v2751_v28, %v2750_v29 }
 0x2ed   : > { %v1157_v21 = vmul.f32 1.442695, %v1141_v18  ;;  %v1104_v22 = vpop.xlane.xlu1 %1103 }
 0x2ee   : > { %v1144_v23 = vsub.f32 %v3100_v33, %v1104_v22  ;;  %v1101_v24 = vpop.xlane.xlu0 %1100  ;;  %v2755_v33 = vunpack.i.l.bf16 %v2754_v14 }
 0x2ef   : > { %2769 = vpow2.f32 %v1157_v21  ;;  %v1143_v25 = vsub.f32 %v3104_v36, %v1101_v24 }
 0x2f0   : > { %2771 = vpow2.f32 %v1159_v20  ;;  %v1163_v41 = vmul.f32 1.442695, %v1144_v23  ;;  %v3181_v36 = vpack.c.bf16 %v2756_v32, %v2755_v33 }
 0x2f1   : > { %v1161_v27 = vmul.f32 1.442695, %v1143_v25 }
 0x2f3   : > { %2773 = vpow2.f32 %v1161_v27 }
 0x2f4   : > { %2775 = vpow2.f32 %v1163_v41 }
 0x2f9   : > { %v3166_v30 = vpop.eup %2769 }
 0x2fa   : > { %v3168_v31 = vpop.eup %2771  ;;  %2477 = vmatprep.mubr.msk.f32.mxu1 %vm1092_vm3, %v3166_v30 }
 0x2fb   : > { %2478 = vmatmul.mubr.msk.f32.vlgmr.msra.gmra.mrb[12].mxu1 %vm1092_vm3, %v3168_v31 }
 0x2fc   : > { %2606 = vmatpush3.bf16.msra.mxu1 %v3084_v19 }
 0x2fd   : > { %v3175_v34 = vpop.eup %2773  ;;  %2612 = vmatprep.subr.bf16.mxu1 %v2611_v38 }
 0x2fe   : > { %v3177_v35 = vpop.eup %2775  ;;  %2484 = vmatprep.mubr.msk.f32.mxu1 %vm1092_vm3, %v3175_v34 }
 0x2ff   : > { %2485 = vmatmul.mubr.msk.f32.vlgmr.msra.gmra.mrb[14].mxu1 %vm1092_vm3, %v3177_v35 }
 0x300   : > { %2614 = vmatpush3.bf16.msra.mxu1 %v2611_v38 }
 0x301   : > { %2620 = vmatprep.subr.bf16.mxu1 %v3181_v36 }
 0x34a   : > { %v1110_v37 = vpop.xlane.xlu0 %1109 }
 0x34b   : > { %v1146_v39 = vsub.f32 %v3110_v42, %v1110_v37 }
 0x34d   : > { %v1167_v19 = vmul.f32 1.442695, %v1146_v39  ;;  %v1116_v40 = vpop.xlane.xlu1 %1115 }
 0x34e   : > { %v1148_v43 = vsub.f32 %v3116_v47, %v1116_v40  ;;  %v1107_v45 = vpop.xlane.xlu0 %1106 }
 0x34f   : > { %2777 = vpow2.f32 %v1167_v19  ;;  %v1145_v46 = vsub.f32 %v3112_v44, %v1107_v45 }
 0x350   : > { %v1171_v48 = vmul.f32 1.442695, %v1148_v43 }
 0x351   : > { %v1165_v50 = vmul.f32 1.442695, %v1145_v46  ;;  %v1113_v51 = vpop.xlane.xlu1 %1112 }
 0x352   : > { %v1147_v52 = vsub.f32 %v3118_v49, %v1113_v51  ;;  %v1122_v54 = vpop.xlane.xlu0 %1121  ;;  %v1192_v51 = vsel %vm1092_vm3, %v3168_v31, 0.0 }
 0x353   : > { %2779 = vpow2.f32 %v1165_v50  ;;  %v1150_v55 = vsub.f32 %v3124_v53, %v1122_v54  ;;  %v1189_v50 = vsel %vm1092_vm3, %v3166_v30, 0.0  ;;  %v1198_v54 = vsel %vm1092_vm3, %v3177_v35, 0.0 }
 0x354   : > { %v1169_v57 = vmul.f32 1.442695, %v1147_v52  ;;  %2781 = vpow2.f32 %v1171_v48  ;;  %v1195_v52 = vsel %vm1092_vm3, %v3175_v34, 0.0 }
 0x355   : > { %v1175_v42 = vmul.f32 1.442695, %v1150_v55  ;;  %v1128_v58 = vpop.xlane.xlu1 %1127 }
 0x356   : > { %2783 = vpow2.f32 %v1169_v57  ;;  %v1119_v60 = vpop.xlane.xlu0 %1118  ;;  %v1152_v47 = vsub.f32 %v3132_v59, %v1128_v58 }
 0x357   : > { %v1149_v62 = vsub.f32 %v3128_v56, %v1119_v60  ;;  %2785 = vpow2.f32 %v1175_v42 }
 0x358   : > { %v1179_v53 = vmul.f32 1.442695, %v1152_v47 }
 0x359   : > { %v2778_v44 = vpop.eup %2777  ;;  %v1173_v63 = vmul.f32 1.442695, %v1149_v62  ;;  %v1125_v0 = vpop.xlane.xlu1 %1124 }
 0x35a   : > { %v1151_v49 = vsub.f32 %v3134_v61, %v1125_v0  ;;  %v1134_v2 = vpop.xlane.xlu0 %1133  ;;  %v1204_v3 = vsel %vm1092_vm3, %v2778_v44, 0.0 }
 0x35b   : > { %2787 = vpow2.f32 %v1173_v63  ;;  %1205 = vadd.xlane.f32.xlu1 %v1204_v3  ;;  %v1154_v6 = vsub.f32 %v3140_v1, %v1134_v2 }
 0x35c   : > { %v1177_v5 = vmul.f32 1.442695, %v1151_v49 }
 0x35d   : > { %v2780_v7 = vpop.eup %2779  ;;  %v1183_v14 = vmul.f32 1.442695, %v1154_v6  ;;  %v2026_v6 = vld [vmem:[%s3301_s2] sm:$0xff] }
 0x35e   : > { %2789 = vpow2.f32 %v1177_v5  ;;  %2491 = vmatprep.mubr.msk.f32.mxu0 %vm1092_vm3, %v2780_v7  ;;  %v1131_v56 = vpop.xlane.xlu0 %1130  ;;  %v1137_v59 = vpop.xlane.xlu1 %1136  ;;  %v1201_v10 = vsel %vm1092_vm3, %v2780_v7, 0.0  ;;  %v2027_v7 = vld [vmem:[%s3301_s2 + $0x8] sm:$0xff] }
 0x35f   : > { %v2782_v11 = vpop.eup %2781  ;;  %2791 = vpow2.f32 %v1179_v53  ;;  %v1153_v61 = vsub.f32 %v3144_v4, %v1131_v56  ;;  %v1155_v12 = vsub.f32 %v3148_v8, %v1137_v59  ;;  %2492 = vmatmul.mubr.msk.f32.vlgmr.msra.gmra.mrb[8].mxu0 %vm1092_vm3, %v2778_v44  ;;  %1202 = vadd.xlane.f32.xlu0 %v1201_v10  ;;  %v2631_v59 = vpack.c.bf16 %v2027_v7, %v2026_v6 }
 0x360   : > { %v2784_v13 = vpop.eup %2783  ;;  %2618 = vmatpush3.bf16.msra.mxu0 %v3091_v26  ;;  %v1210_v8 = vsel %vm1092_vm3, %v2782_v11, 0.0 }
 0x361   : > { %v1181_v1 = vmul.f32 1.442695, %v1153_v61  ;;  %v1185_v15 = vmul.f32 1.442695, %v1155_v12  ;;  %2498 = vmatprep.mubr.msk.f32.mxu1 %vm1092_vm3, %v2784_v13  ;;  %v1207_v16 = vsel %vm1092_vm3, %v2784_v13, 0.0  ;;  %v2786_v18 = vpop.eup %2785 }
 0x362   : > { %2499 = vmatmul.mubr.msk.f32.vlgmr.msra.gmra.mrb[16].mxu1 %vm1092_vm3, %v2782_v11  ;;  %v1140_v17 = vpop.xlane.xlu0 %1139  ;;  %1208 = vadd.xlane.f32.xlu1 %v1207_v16  ;;  %v2764_v4 = vpop.permute.xlu1 %2763  ;;  %v1216_v41 = vsel %vm1092_vm3, %v2786_v18, 0.0 }
 0x363   : > { %2793 = vpow2.f32 %v1181_v1  ;;  %2622 = vmatpush3.bf16.msra.mxu1 %v3181_v36  ;;  %v1156_v20 = vsub.f32 %v3150_v9, %v1140_v17  ;;  %v2766_v26 = vunpack.i.h.bf16 %v2764_v4  ;;  %v2765_v21 = vunpack.i.l.bf16 %v2764_v4  ;;  %1211 = vadd.xlane.f32.xlu0 %v1210_v8  ;;  %v2028_v1 = vld [vmem:[%s3301_s2 + $0x10] sm:$0xff] }
 0x364   : > { %2795 = vpow2.f32 %v1185_v15  ;;  %v2029_v15 = vld [vmem:[%s3301_s2 + $0x18] sm:$0xff] }
 0x365   : > { %v2788_v22 = vpop.eup %2787  ;;  %2797 = vpow2.f32 %v1183_v14  ;;  %v1187_v23 = vmul.f32 1.442695, %v1156_v20  ;;  %v2627_v24 = vpack.c.bf16 %v2766_v26, %v2765_v21  ;;  %v2635_v17 = vpack.c.bf16 %v2029_v15, %v2028_v1 }
 0x366   : > { %2505 = vmatprep.mubr.msk.f32.mxu0 %vm1092_vm3, %v2788_v22  ;;  %v2759_v25 = vpop.permute.xlu0 %2758  ;;  %v1213_v33 = vsel %vm1092_vm3, %v2788_v22, 0.0 }
 0x367   : > { %2799 = vpow2.f32 %v1187_v23  ;;  %v2761_v27 = vunpack.i.h.bf16 %v2759_v25  ;;  %v2760_v28 = vunpack.i.l.bf16 %v2759_v25  ;;  %2506 = vmatmul.mubr.msk.f32.vlgmr.msra.gmra.mrb[10].mxu0 %vm1092_vm3, %v2786_v18  ;;  %1217 = vadd.xlane.f32.xlu0 %v1216_v41 }
 0x368   : > { %v2790_v9 = vpop.eup %2789  ;;  %2628 = vmatprep.subr.bf16.mxu1 %v2627_v24 }
 0x369   : > { %v2792_v29 = vpop.eup %2791  ;;  %v2623_v38 = vpack.c.bf16 %v2761_v27, %v2760_v28  ;;  %2512 = vmatprep.mubr.msk.f32.mxu1 %vm1092_vm3, %v2790_v9  ;;  %v1219_v32 = vsel %vm1092_vm3, %v2790_v9, 0.0 }
 0x36a   : > { %2513 = vmatmul.mubr.msk.f32.vlgmr.msra.gmra.mrb[18].mxu1 %vm1092_vm3, %v2792_v29  ;;  %1220 = vadd.xlane.f32.xlu1 %v1219_v32  ;;  %v1222_v39 = vsel %vm1092_vm3, %v2792_v29, 0.0 }
 0x36b   : > { %2630 = vmatpush3.bf16.msra.mxu1 %v2627_v24  ;;  %1214 = vadd.xlane.f32.xlu0 %v1213_v33 }
 0x36c   : > { %2624 = vmatprep.subr.bf16.mxu0 %v2623_v38 }
 0x36d   : > { %v2794_v36 = vpop.eup %2793  ;;  %2626 = vmatpush3.bf16.msra.mxu0 %v2623_v38 }
 0x36e   : > { %v2796_v37 = vpop.eup %2795  ;;  %2519 = vmatprep.mubr.msk.f32.mxu0 %vm1092_vm3, %v2794_v36  ;;  %v1225_v19 = vsel %vm1092_vm3, %v2794_v36, 0.0  ;;  %2632 = vmatprep.subr.bf16.mxu0 %v2631_v59 }
 0x36f   : > { %v2798_v40 = vpop.eup %2797  ;;  %2526 = vmatprep.mubr.msk.f32.mxu1 %vm1092_vm3, %v2796_v37  ;;  %1223 = vadd.xlane.f32.xlu0 %v1222_v39  ;;  %v1231_v46 = vsel %vm1092_vm3, %v2796_v37, 0.0 }
 0x370   : > { %2520 = vmatmul.mubr.msk.f32.vlgmr.msra.gmra.mrb[12].mxu0 %vm1092_vm3, %v2798_v40  ;;  %1226 = vadd.xlane.f32.xlu1 %v1225_v19  ;;  %v1228_v45 = vsel %vm1092_vm3, %v2798_v40, 0.0 }
 0x371   : > { %v2800_v43 = vpop.eup %2799  ;;  %2634 = vmatpush3.bf16.msra.mxu0 %v2631_v59 }
 0x372   : > { %2527 = vmatmul.mubr.msk.f32.vlgmr.msra.gmra.mrb[20].mxu1 %vm1092_vm3, %v2800_v43  ;;  %v1234_v48 = vsel %vm1092_vm3, %v2800_v43, 0.0  ;;  %2636 = vmatprep.subr.bf16.mxu0 %v2635_v17 }
 0x373   : > { %1229 = vadd.xlane.f32.xlu0 %v1228_v45 }
 0x374   : > { %1232 = vadd.xlane.f32.xlu1 %v1231_v46 }
 0x375   : > { %2638 = vmatpush3.bf16.msra.mxu0 %v2635_v17 }
 0x377   : > { %1235 = vadd.xlane.f32.xlu0 %v1234_v48 }
 0x378   : > { %1190 = vadd.xlane.f32.xlu1 %v1189_v50 }
 0x37b   : > { %1193 = vadd.xlane.f32.xlu0 %v1192_v51 }
 0x37c   : > { %1196 = vadd.xlane.f32.xlu1 %v1195_v52 }
 0x37f   : > { %1199 = vadd.xlane.f32.xlu0 %v1198_v54 }
 0x3ce   : > { %v3232_v55 = vpop.f32.mrb[12].mxu1 }
 0x3cf   : > { %v3234_v57 = vpop.f32.mrb[13].mxu1 }
 0x3d2   : > { %v3236_v42 = vpop.f32.mrb[14].mxu1 }
 0x3d3   : > { %v3238_v30 = vpop.f32.mrb[15].mxu1 }
 0x3e8   : > { %v1206_v31 = vpop.xlane.xlu1 %1205 }
 0x3e9   : > { %2801 = vrcp.f32 %v1206_v31 }
 0x3ec   : > { %v1203_v58 = vpop.xlane.xlu0 %1202 }
 0x3ed   : > { %2803 = vrcp.f32 %v1203_v58 }
 0x3ef   : > { %v1209_v34 = vpop.xlane.xlu1 %1208 }
 0x3f0   : > { %v1212_v60 = vpop.xlane.xlu0 %1211  ;;  %2805 = vrcp.f32 %v1209_v34 }
 0x3f1   : > { %2807 = vrcp.f32 %v1212_v60 }
 0x3f3   : > { %v2802_v44 = vpop.eup %2801 }
 0x3f4   : > { %v1218_v47 = vpop.xlane.xlu0 %1217 }
 0x3f5   : > { %2809 = vrcp.f32 %v1218_v47 }
 0x3f7   : > { %v1221_v35 = vpop.xlane.xlu1 %1220  ;;  %v2804_v49 = vpop.eup %2803 }
 0x3f8   : > { %v1215_v62 = vpop.xlane.xlu0 %1214  ;;  %2811 = vrcp.f32 %v1221_v35 }
 0x3f9   : > { %2813 = vrcp.f32 %v1215_v62 }
 0x3fa   : > { %v2806_v10 = vpop.eup %2805 }
 0x3fb   : > { %v2808_v61 = vpop.eup %2807 }
 0x3fc   : > { %v1224_v63 = vpop.xlane.xlu0 %1223 }
 0x3fd   : > { %v1227_v2 = vpop.xlane.xlu1 %1226  ;;  %2815 = vrcp.f32 %v1224_v63 }
 0x3fe   : > { %2817 = vrcp.f32 %v1227_v2 }
 0x3ff   : > { %v2810_v4 = vpop.eup %2809 }
 0x400   : > { %v1230_v13 = vpop.xlane.xlu0 %1229 }
 0x401   : > { %v1233_v16 = vpop.xlane.xlu1 %1232 }
 0x402   : > { %2819 = vrcp.f32 %v1233_v16  ;;  %v2812_v21 = vpop.eup %2811  ;;  %v2314_v16 = vld [vmem:[%s3302_s3] ss:$0 sm:$0xff] }
 0x403   : > { %2821 = vrcp.f32 %v1230_v13  ;;  %v2814_v24 = vpop.eup %2813 }
 0x404   : > { %v1236_v22 = vpop.xlane.xlu0 %1235 }
 0x405   : > { %2823 = vrcp.f32 %v1236_v22  ;;  %v1191_v46 = vpop.xlane.xlu1 %1190 }
 0x406   : > { %2825 = vrcp.f32 %v1191_v46 }
 0x407   : > { %v2816_v27 = vpop.eup %2815 }
 0x408   : > { %v2818_v9 = vpop.eup %2817  ;;  %v1194_v48 = vpop.xlane.xlu0 %1193 }
 0x409   : > { %v1197_v50 = vpop.xlane.xlu1 %1196  ;;  %2827 = vrcp.f32 %v1194_v48 }
 0x40a   : > { %2829 = vrcp.f32 %v1197_v50 }
 0x40c   : > { %v2820_v36 = vpop.eup %2819  ;;  %v1200_v51 = vpop.xlane.xlu0 %1199 }
 0x40d   : > { %v2822_v39 = vpop.eup %2821  ;;  %2831 = vrcp.f32 %v1200_v51 }
 0x40f   : > { %v2824_v43 = vpop.eup %2823 }
 0x410   : > { %v2826_v47 = vpop.eup %2825 }
 0x413   : > { %v2828_v35 = vpop.eup %2827 }
 0x414   : > { %v2830_v63 = vpop.eup %2829  ;;  %v1950_v2 = vmul.f32 %v2828_v35, %v3232_v55 }
 0x415   : > { %v1951_v6 = vmul.f32 %v2830_v63, %v3238_v30 }
 0x432   : > { %v2493_v0 = vpop.f32.mrb[8].mxu0 }
 0x433   : > { %v1954_v3 = vmul.f32 %v2802_v44, %v2493_v0  ;;  %v1489_v53 = vpop.f32.mrb[9].mxu0  ;;  %v1949_v44 = vmul.f32 %v2826_v47, %v3234_v57 }
 0x434   : > { %v1953_v5 = vmul.f32 %v2804_v49, %v1489_v53 }
 0x435   : > { %v2500_v56 = vpop.f32.mrb[16].mxu1  ;;  %1971 = vrot.lane.b32.xlu0 %v1954_v3, %s2878_s25 }
 0x436   : > { %v1576_v11 = vpop.f32.mrb[17].mxu1  ;;  %1969 = vrot.lane.b32.xlu1 %v1953_v5, %s2878_s25  ;;  %v1956_v14 = vmul.f32 %v2808_v61, %v2500_v56  ;;  %v2832_v5 = vpop.eup %2831 }
 0x437   : > { %v1955_v12 = vmul.f32 %v2806_v10, %v1576_v11  ;;  %v1952_v11 = vmul.f32 %v2832_v5, %v3236_v42 }
 0x439   : > { %1973 = vrot.lane.b32.xlu0 %v1955_v12, %s2878_s25 }
 0x43a   : > { %v2507_v8 = vpop.f32.mrb[10].mxu0  ;;  %1975 = vrot.lane.b32.xlu1 %v1956_v14, %s2878_s25 }
 0x43b   : > { %v1958_v18 = vmul.f32 %v2810_v4, %v2507_v8  ;;  %v1663_v20 = vpop.f32.mrb[11].mxu0 }
 0x43c   : > { %v1957_v41 = vmul.f32 %v2814_v24, %v1663_v20 }
 0x43d   : > { %v2514_v26 = vpop.f32.mrb[18].mxu1 }
 0x43e   : > { %v1750_v23 = vpop.f32.mrb[19].mxu1  ;;  %1987 = vrot.lane.b32.xlu1 %v1958_v18, %s2879_s30  ;;  %v1960_v29 = vmul.f32 %v2816_v27, %v2514_v26 }
 0x43f   : > { %v1959_v25 = vmul.f32 %v2812_v21, %v1750_v23 }
 0x441   : > { %1989 = vrot.lane.b32.xlu0 %v1959_v25, %s2879_s30 }
 0x442   : > { %1985 = vrot.lane.b32.xlu1 %v1957_v41, %s2879_s30 }
 0x443   : > { %v2521_v28 = vpop.f32.mrb[12].mxu0 }
 0x444   : > { %v1837_v38 = vpop.f32.mrb[13].mxu0  ;;  %v1962_v40 = vmul.f32 %v2822_v39, %v2521_v28 }
 0x445   : > { %v1961_v32 = vmul.f32 %v2818_v9, %v1837_v38  ;;  %v2528_v33 = vpop.f32.mrb[20].mxu1 }
 0x446   : > { %1991 = vrot.lane.b32.xlu1 %v1960_v29, %s2879_s30  ;;  %v1924_v37 = vpop.f32.mrb[21].mxu1  ;;  %v1964_v45 = vmul.f32 %v2824_v43, %v2528_v33 }
 0x447   : > { %2001 = vrot.lane.b32.xlu0 %v1961_v32, %s2880_s5  ;;  %v1963_v19 = vmul.f32 %v2820_v36, %v1924_v37 }
 0x44a   : > { %2003 = vrot.lane.b32.xlu1 %v1962_v40, %s2880_s5 }
 0x44b   : > { %2005 = vrot.lane.b32.xlu0 %v1963_v19, %s2880_s5 }
 0x44e   : > { %2007 = vrot.lane.b32.xlu1 %v1964_v45, %s2880_s5 }
 0x4a7   : > { %v1972_v54 = vpop.permute.xlu0 %1971 }
 0x4a8   : > { %v1970_v52 = vpop.permute.xlu1 %1969  ;;  %v2014_v56 = vsel %vm383_vm1, %v1950_v2, %v1972_v54 }
 0x4a9   : > { %v2013_v0 = vsel %vm383_vm1, %v1949_v44, %v1970_v52 }
 0x4ab   : > { %v1974_v60 = vpop.permute.xlu0 %1973 }
 0x4ac   : > { %v1976_v58 = vpop.permute.xlu1 %1975  ;;  %v2015_v57 = vsel %vm383_vm1, %v1951_v6, %v1974_v60 }
 0x4ad   : > { %v2016_v13 = vsel %vm383_vm1, %v1952_v11, %v1976_v58 }
 0x4b0   : > { %v1988_v31 = vpop.permute.xlu1 %1987 }
 0x4b1   : > { %v2018_v59 = vsel %vm1092_vm3, %v2014_v56, %v1988_v31 }
 0x4b3   : > { %v1990_v34 = vpop.permute.xlu0 %1989 }
 0x4b4   : > { %v1986_v62 = vpop.permute.xlu1 %1985  ;;  %v2019_v55 = vsel %vm1092_vm3, %v2015_v57, %v1990_v34 }
 0x4b5   : > { %v2017_v3 = vsel %vm1092_vm3, %v2013_v0, %v1986_v62 }
 0x4b8   : > { %v1992_v49 = vpop.permute.xlu1 %1991 }
 0x4b9   : > { %v2002_v53 = vpop.permute.xlu0 %2001  ;;  %v2020_v14 = vsel %vm1092_vm3, %v2016_v13, %v1992_v49 }
 0x4ba   : > { %v2022_v7 = vsel %vm2021_vm4, %v2017_v3, %v2002_v53 }
 0x4bb   : > { %2537 = vmatprep.mubr.msk.f32.mxu0 %vm257_vm0, %v2022_v7 }
 0x4bc   : > { %v2004_v10 = vpop.permute.xlu1 %2003 }
 0x4bd   : > { %v2023_v61 = vsel %vm2021_vm4, %v2018_v59, %v2004_v10  ;;  %v2006_v12 = vpop.permute.xlu0 %2005 }
 0x4be   : > { %v2024_v30 = vsel %vm2021_vm4, %v2019_v55, %v2006_v12  ;;  %2538 = vmatmul.mubr.msk.f32.vlgmr.msra.gmra.mrb[14].mxu0 %vm257_vm0, %v2023_v61 }
 0x4bf   : > { %2540 = vmatprep.mubr.msk.f32.mxu0 %vm257_vm0, %v2024_v30 }
 0x4c0   : > { %v2008_v1 = vpop.permute.xlu1 %2007 }
 0x4c1   : > { %v2025_v15 = vsel %vm2021_vm4, %v2020_v14, %v2008_v1 }
 0x4c2   : > { %2541 = vmatmul.mubr.msk.f32.gmra.mrb[16].mxu0 %vm257_vm0, %v2025_v15 }
 0x591   : > { %v2539_v42 = vpop.f32.mrb[14].mxu0 }
 0x592   : > { %v2115_v17 = vpop.f32.mrb[15].mxu0  ;;  %v2121_v4 = vadd.f32 %v2539_v42, %v2314_v16 }
 0x593   : > { %v2116_v8 = vadd.f32 %v2314_v16, %v2115_v17 }
 0x594   : > { %v2139_v22 = vcombine.high %v2121_v4, %v2121_v4 }
 0x595   : > { %v2542_v18 = vpop.f32.mrb[16].mxu0  ;;  %v2138_v25 = vcombine.high %v2116_v8, %v2116_v8 }
 0x596   : > { %v2131_v20 = vadd.f32 %v2542_v18, %v2314_v16  ;;  %v2125_v26 = vpop.f32.mrb[17].mxu0 }
 0x597   : > { %v2126_v21 = vadd.f32 %v2314_v16, %v2125_v26 }
 0x598   : > { %v2146_v23 = vcombine.low %v2131_v20, %v2131_v20  ;;  %v2320_v24 = vcombine.high %v2131_v20, %v2131_v20 }
 0x599   : > { %v2144_v41 = vcombine.low %v2126_v21, %v2126_v21  ;;  %v2319_v27 = vcombine.high %v2126_v21, %v2126_v21 }
 0x59a   : > { %v2155_v28 = vsel %vm2152_vm5, %v2121_v4, %v2146_v23  ;;  %v2156_v9 = vsel %vm2152_vm5, %v2139_v22, %v2320_v24 }
 0x59b   : > { %2159 = vst.msk [vmem:[%s235_s12 + $0x10] sm:$0xff] %vm257_vm0, %v2155_v28  ;;  %2160 = vst.msk [vmem:[%s235_s12 + $0x18] sm:$0xff] %vm257_vm0, %v2156_v9  ;;  %v2153_v29 = vsel %vm2152_vm5, %v2116_v8, %v2144_v41  ;;  %v2154_v38 = vsel %vm2152_vm5, %v2138_v25, %v2319_v27 }
 0x59c   : > { %2157 = vst.msk [vmem:[%s235_s12] sm:$0xff] %vm257_vm0, %v2153_v29  ;;  %2158 = vst.msk [vmem:[%s235_s12 + $0x8] sm:$0xff] %vm257_vm0, %v2154_v38 }
 0x59d PF: > { %s14_s19 = sadd.s32 1, %s2871_s19   ;;  %s3306_s15 = smov %s2863_s17 }
 0x59e   : > { %p11_p7 = scmp.ge.s32.totalorder %s14_s19, 6   ;;  %s3307_s16 = smov %s2867_s18 }
 0x59f   : > { %s3308_s17 = smov %s3311_s20  ;;  %s3309_s18 = smov %s3315_s21 }
 0x5a0   :  { %13 = sbr.rel (!%p11_p7) target bundleno = 3 (0x3), region = 66 }

</bundles_post_ra>
